<compile_context>
chip_gen: v6e
topology: v6e:2x2x1
jax: 0.10.0
libtpu: 0.0.40
codegen_flags: <defaults>
</compile_context>

<pallas_src>
import functools

import jax
import jax.numpy as jnp
from jax import lax
from jax.experimental import pallas as pl
from jax.experimental.pallas import tpu as pltpu

NUM_SUB = 3
LN_EPS = 1e-5
GATE_PAD = 128  # lane-dense padding for the S-wide gate path


def _master_cell_kernel(
    # inputs
    lhs_ref,      # (bb, I+S*H)   bf16   [x | h_sub_0 | ... | h_sub_{S-1}]
    hm_ref,       # (bb, H)       f32    prev_master_h
    gn_ref,       # (bb, 128)     f32    gumbel noise, zero-padded past S
    wsub_ref,     # (I+S*H, S*H)  bf16   fused sub-cell weight
    bsub_ref,     # (1, S*H)      f32    b_ih + b_hh per sub cell
    wg_ref,       # (H, 128)      f32    gate weight, zero-padded past S
    bg_ref,       # (1, 128)      f32
    wf_ref,       # (H, H)        bf16   fusion weight
    bf_ref,       # (1, H)        f32
    gamma_ref,    # (1, H)        f32    LayerNorm weight
    beta_ref,     # (1, H)        f32    LayerNorm bias
    # outputs
    master_out_ref,  # (bb, H)    f32
    gate_out_ref,    # (bb, 128)  f32    padded one-hot (slice [:, :S] outside)
    sub_out_ref,     # (bb, S*H)  f32    lane-dense new sub states
    *,
    tau: float,
    num_sub: int,
    hidden: int,
):
    h_m = hm_ref[...].astype(jnp.float32)                     # (bb, H)

    # ---- gate: Linear(H -> S) + hard Gumbel-softmax, kept fully in f32 so
    #      the argmax tie-breaking is bit-identical to the unpadded version ----
    logits = jnp.dot(h_m, wg_ref[...], preferred_element_type=jnp.float32) + bg_ref[...]
    y = (logits + gn_ref[...]) / tau                          # (bb, 128)
    lane = lax.broadcasted_iota(jnp.int32, y.shape, 1)
    y = jnp.where(lane < num_sub, y, -jnp.inf)                # mask padded lanes
    y_max = jnp.max(y, axis=-1, keepdims=True)
    cand = jnp.where(y >= y_max, lane, jnp.int32(y.shape[-1]))
    first_idx = jnp.min(cand, axis=-1, keepdims=True)         # (bb, 1), in [0, S)
    onehot = (lane == first_idx).astype(jnp.float32)
    gate_out_ref[...] = onehot.astype(gate_out_ref.dtype)     # lane-dense store

    # ---- all sub cells in ONE MXU call (bf16 operands, f32 accumulation) ----
    pre = jnp.dot(lhs_ref[...], wsub_ref[...],
                  preferred_element_type=jnp.float32) + bsub_ref[...]   # (bb, S*H)
    new_h_all = jnp.tanh(pre)                                  # f32
    sub_out_ref[...] = new_h_all.astype(sub_out_ref.dtype)     # lane-dense store

    # ---- gated selection (== einsum('bs,sbh->bh') with a one-hot gate):
    #      cheap compare/select against the argmax index, no mul+add chain ----
    H = hidden
    weighted = new_h_all[:, 0:H]
    for s in range(1, num_sub):
        weighted = jnp.where(first_idx == s, new_h_all[:, s * H:(s + 1) * H], weighted)

    # ---- fusion Linear + residual + LayerNorm (single-pass stats) + sigmoid ----
    fused = jnp.dot(weighted.astype(wf_ref.dtype), wf_ref[...],
                    preferred_element_type=jnp.float32) + bf_ref[...]
    z = h_m + fused
    mu = jnp.mean(z, axis=-1, keepdims=True)
    ms = jnp.mean(z * z, axis=-1, keepdims=True)
    var = jnp.maximum(ms - mu * mu, 0.0)
    z_hat = (z - mu) * lax.rsqrt(var + LN_EPS)
    ln_out = z_hat * gamma_ref[...] + beta_ref[...]
    master_out_ref[...] = jax.nn.sigmoid(ln_out).astype(master_out_ref.dtype)


def pack_params(params, compute_dtype=jnp.bfloat16):
    """One-time static weight packing (fused sub-cell weight, padded gate)."""
    w_ih = params["w_ih"]     # (S, I, H)
    w_hh = params["w_hh"]     # (S, H, H)
    S, I, H = w_ih.shape

    # rows [0:I]  : [w_ih_0 | w_ih_1 | ... ]
    top = jnp.concatenate([w_ih[s] for s in range(S)], axis=1)           # (I, S*H)
    # rows [I:.]  : block_diag(w_hh_0, ..., w_hh_{S-1})
    blk = jnp.zeros((S * H, S * H), w_hh.dtype)
    for s in range(S):
        blk = blk.at[s * H:(s + 1) * H, s * H:(s + 1) * H].set(w_hh[s])
    w_sub = jnp.concatenate([top, blk], axis=0).astype(compute_dtype)    # (I+S*H, S*H)
    b_sub = jnp.concatenate(
        [params["b_ih"][s] + params["b_hh"][s] for s in range(S)], axis=1
    ).astype(jnp.float32)                                                # (1, S*H)

    wg_pad = jnp.zeros((H, GATE_PAD), jnp.float32).at[:, :S].set(
        params["w_gate"].astype(jnp.float32))
    bg_pad = jnp.zeros((1, GATE_PAD), jnp.float32).at[:, :S].set(
        params["b_gate"].astype(jnp.float32))

    return {
        "w_sub": w_sub, "b_sub": b_sub,
        "w_gate_pad": wg_pad, "b_gate_pad": bg_pad,
        "w_fusion": params["w_fusion"].astype(compute_dtype),
        "b_fusion": params["b_fusion"].astype(jnp.float32),
        "ln_gamma": params["ln_gamma"].astype(jnp.float32),
        "ln_beta": params["ln_beta"].astype(jnp.float32),
    }


def master_binary_memory_rnn_cell(x, prev_master_h, prev_sub_h, gumbel_noise,
                                  packed, tau=1.0):
    """Forward pass. Returns (master_h_new, gate_onehot, new_sub_h)."""
    if tau <= 0.0:
        raise ValueError("tau must be > 0 for gumbel-softmax")

    B, I = x.shape
    _, H = prev_master_h.shape
    S = prev_sub_h.shape[0]
    K = I + S * H
    compute_dtype = packed["w_sub"].dtype

    # Layout plumbing kept outside the kernel (lane-dense MXU operands inside).
    h_flat = jnp.transpose(prev_sub_h, (1, 0, 2)).reshape(B, S * H)
    lhs = jnp.concatenate([x, h_flat], axis=1).astype(compute_dtype)      # (B, K)
    gn_pad = jnp.zeros((B, GATE_PAD), jnp.float32).at[:, :S].set(
        gumbel_noise.astype(jnp.float32))
    h_m = prev_master_h.astype(jnp.float32)

    block_b = B if B <= 256 else 256
    grid = (pl.cdiv(B, block_b),)

    batch_map = lambda i: (i, 0)
    batch_map3 = lambda i: (0, i, 0)   # unused; kept for clarity if sub state layout changes
    const_map = lambda i: (0, 0)

    in_specs = [
        pl.BlockSpec((block_b, K), batch_map),            # lhs
        pl.BlockSpec((block_b, H), batch_map),            # prev_master_h
        pl.BlockSpec((block_b, GATE_PAD), batch_map),     # gumbel noise (padded)
        pl.BlockSpec((K, S * H), const_map),              # w_sub (resident)
        pl.BlockSpec((1, S * H), const_map),              # b_sub
        pl.BlockSpec((H, GATE_PAD), const_map),           # w_gate (padded)
        pl.BlockSpec((1, GATE_PAD), const_map),           # b_gate (padded)
        pl.BlockSpec((H, H), const_map),                  # w_fusion
        pl.BlockSpec((1, H), const_map),                  # b_fusion
        pl.BlockSpec((1, H), const_map),                  # ln_gamma
        pl.BlockSpec((1, H), const_map),                  # ln_beta
    ]
    out_specs = (
        pl.BlockSpec((block_b, H), batch_map),            # master_h_new
        pl.BlockSpec((block_b, GATE_PAD), batch_map),     # gate one-hot (padded)
        pl.BlockSpec((block_b, S * H), batch_map),        # new sub states (flat)
    )
    out_shape = (
        jax.ShapeDtypeStruct((B, H), jnp.float32),
        jax.ShapeDtypeStruct((B, GATE_PAD), jnp.float32),
        jax.ShapeDtypeStruct((B, S * H), jnp.float32),
    )

    kernel = functools.partial(_master_cell_kernel, tau=float(tau),
                               num_sub=S, hidden=H)

    # TODO(synk): when this cell is stepped over a time axis, pull the time
    # loop inside the kernel (grid axis marked "arbitrary", VMEM-resident
    # master/sub state) instead of launching per step.
    # NOTE: for large H on v7x (64 MiB VMEM / 32 MiB scoped default), add
    # pltpu.CompilerParams(vmem_limit_bytes=...) and K-tile w_sub.
    master, gate_pad, sub_flat = pl.pallas_call(
        kernel,
        grid=grid,
        in_specs=in_specs,
        out_specs=out_specs,
        out_shape=out_shape,
        input_output_aliases={1: 0},   # prev_master_h buffer -> master_h_new
        compiler_params=pltpu.CompilerParams(
            dimension_semantics=("parallel",)),
    )(lhs, h_m, gn_pad,
      packed["w_sub"], packed["b_sub"],
      packed["w_gate_pad"], packed["b_gate_pad"],
      packed["w_fusion"], packed["b_fusion"],
      packed["ln_gamma"], packed["ln_beta"])

    gate_onehot = gate_pad[:, :S]
    new_sub_h = jnp.transpose(sub_flat.reshape(B, S, H), (1, 0, 2))
    return master, gate_onehot, new_sub_h


def init_params(key, input_size, hidden_size, num_sub=NUM_SUB):
    """Deterministic synthetic parameter init (weights stored in (in, out) layout)."""
    keys = jax.random.split(key, 8)
    scale = 0.1
    return {
        "w_gate":   scale * jax.random.normal(keys[0], (hidden_size, num_sub), jnp.float32),
        "b_gate":   scale * jax.random.normal(keys[1], (1, num_sub), jnp.float32),
        "w_fusion": scale * jax.random.normal(keys[2], (hidden_size, hidden_size), jnp.float32),
        "b_fusion": scale * jax.random.normal(keys[3], (1, hidden_size), jnp.float32),
        "ln_gamma": jnp.ones((1, hidden_size), jnp.float32),
        "ln_beta":  jnp.zeros((1, hidden_size), jnp.float32),
        # sub-cell (tanh RNNCell) parameters, one set per sub cell
        "w_ih": scale * jax.random.normal(keys[4], (num_sub, input_size, hidden_size), jnp.float32),
        "b_ih": scale * jax.random.normal(keys[5], (num_sub, 1, hidden_size), jnp.float32),
        "w_hh": scale * jax.random.normal(keys[6], (num_sub, hidden_size, hidden_size), jnp.float32),
        "b_hh": scale * jax.random.normal(keys[7], (num_sub, 1, hidden_size), jnp.float32),
    }


if __name__ == "__main__":
    B, INPUT_SIZE, HIDDEN, S = 2, 4, 32, NUM_SUB
    tau = 1.0

    root = jax.random.PRNGKey(0)
    k_par, k_x, k_hm, k_hs, k_g = jax.random.split(root, 5)

    params = init_params(k_par, INPUT_SIZE, HIDDEN, S)
    packed = pack_params(params)   # one-time static packing / padding / bf16 cast

    x = jax.random.normal(k_x, (B, INPUT_SIZE), jnp.float32)
    prev_master_h = jax.random.normal(k_hm, (B, HIDDEN), jnp.float32)
    prev_sub_h = jax.random.normal(k_hs, (S, B, HIDDEN), jnp.float32)
    # TODO(synk): PyTorch's F.gumbel_softmax samples its own noise internally;
    # here the Gumbel noise is sampled in the wrapper and fed to the kernel.
    gumbel_noise = jax.random.gumbel(k_g, (B, S), jnp.float32)

    master_h_new, gate_onehot, new_sub_h = jax.block_until_ready(
        master_binary_memory_rnn_cell(x, prev_master_h, prev_sub_h,
                                      gumbel_noise, packed, tau=tau)
    )

    assert master_h_new.shape == (B, HIDDEN)
    assert gate_onehot.shape == (B, S)
    assert new_sub_h.shape == (S, B, HIDDEN)
    # gate must be exactly one-hot per batch row
    assert bool(jnp.all(jnp.sum(gate_onehot, axis=-1) == 1.0))
    # master_h went through sigmoid
    assert bool(jnp.all((master_h_new > 0.0) & (master_h_new < 1.0)))

    print("KERNEL_OK")
</pallas_src>

<mosaic_0001>
module attributes {stable_mosaic.version = 11 : i64} {
  func.func @_master_cell_kernel(%arg0: i32, %arg1: memref<2x100xbf16, #tpu.memory_space<vmem>>, %arg2: memref<2x32xf32, #tpu.memory_space<vmem>>, %arg3: memref<2x128xf32, #tpu.memory_space<vmem>>, %arg4: memref<100x96xbf16, #tpu.memory_space<vmem>>, %arg5: memref<1x96xf32, #tpu.memory_space<vmem>>, %arg6: memref<32x128xf32, #tpu.memory_space<vmem>>, %arg7: memref<1x128xf32, #tpu.memory_space<vmem>>, %arg8: memref<32x32xbf16, #tpu.memory_space<vmem>>, %arg9: memref<1x32xf32, #tpu.memory_space<vmem>>, %arg10: memref<1x32xf32, #tpu.memory_space<vmem>>, %arg11: memref<1x32xf32, #tpu.memory_space<vmem>>, %arg12: memref<2x32xf32, #tpu.memory_space<vmem>>, %arg13: memref<2x128xf32, #tpu.memory_space<vmem>>, %arg14: memref<2x96xf32, #tpu.memory_space<vmem>>) attributes {dimension_semantics = [#tpu.dimension_semantics<parallel>], iteration_bounds = array<i64: 1>, scalar_prefetch = 0 : i64, scratch_operands = 0 : i64, tpu.core_type = #tpu.core_type<tc>, window_params = [{transform_indices = @transform_0, window_bounds = array<i64: 2, 100>}, {transform_indices = @transform_1, window_bounds = array<i64: 2, 32>}, {transform_indices = @transform_2, window_bounds = array<i64: 2, 128>}, {pipeline_mode = #tpu.pipeline_mode<synchronous>, transform_indices = @transform_3, window_bounds = array<i64: 100, 96>}, {pipeline_mode = #tpu.pipeline_mode<synchronous>, transform_indices = @transform_4, window_bounds = array<i64: 1, 96>}, {pipeline_mode = #tpu.pipeline_mode<synchronous>, transform_indices = @transform_5, window_bounds = array<i64: 32, 128>}, {pipeline_mode = #tpu.pipeline_mode<synchronous>, transform_indices = @transform_6, window_bounds = array<i64: 1, 128>}, {pipeline_mode = #tpu.pipeline_mode<synchronous>, transform_indices = @transform_7, window_bounds = array<i64: 32, 32>}, {pipeline_mode = #tpu.pipeline_mode<synchronous>, transform_indices = @transform_8, window_bounds = array<i64: 1, 32>}, {pipeline_mode = #tpu.pipeline_mode<synchronous>, transform_indices = @transform_9, window_bounds = array<i64: 1, 32>}, {pipeline_mode = #tpu.pipeline_mode<synchronous>, transform_indices = @transform_10, window_bounds = array<i64: 1, 32>}, {transform_indices = @transform_11, window_bounds = array<i64: 2, 32>}, {transform_indices = @transform_12, window_bounds = array<i64: 2, 128>}, {transform_indices = @transform_13, window_bounds = array<i64: 2, 96>}]} {
    %c0 = arith.constant 0 : index
    %c0_0 = arith.constant 0 : index
    %0 = vector.load %arg2[%c0, %c0_0] : memref<2x32xf32, #tpu.memory_space<vmem>>, vector<2x32xf32>
    %c0_1 = arith.constant 0 : index
    %c0_2 = arith.constant 0 : index
    %1 = vector.load %arg6[%c0_1, %c0_2] : memref<32x128xf32, #tpu.memory_space<vmem>>, vector<32x128xf32>
    %cst = arith.constant dense<0.000000e+00> : vector<2x128xf32>
    %2 = tpu.matmul %0, %1, %cst {dimension_numbers = #tpu.dot_dimension_numbers<[1], [0], [0], [1], [0, 0, 1, 1], [], []>} : vector<2x32xf32>, vector<32x128xf32>, vector<2x128xf32> -> vector<2x128xf32>
    %c0_3 = arith.constant 0 : index
    %c0_4 = arith.constant 0 : index
    %3 = vector.load %arg7[%c0_3, %c0_4] : memref<1x128xf32, #tpu.memory_space<vmem>>, vector<1x128xf32>
    %4 = vector.broadcast %3 : vector<1x128xf32> to vector<2x128xf32>
    %5 = arith.addf %2, %4 : vector<2x128xf32>
    %c0_5 = arith.constant 0 : index
    %c0_6 = arith.constant 0 : index
    %6 = vector.load %arg3[%c0_5, %c0_6] : memref<2x128xf32, #tpu.memory_space<vmem>>, vector<2x128xf32>
    %7 = arith.addf %5, %6 : vector<2x128xf32>
    %cst_7 = arith.constant 1.000000e+00 : f32
    %8 = vector.broadcast %cst_7 : f32 to vector<2x128xf32>
    %9 = arith.divf %7, %8 : vector<2x128xf32>
    %10 = tpu.iota {dimensions = array<i32: 1>} : vector<2x128xi32>
    %c3_i32 = arith.constant 3 : i32
    %11 = vector.broadcast %c3_i32 : i32 to vector<2x128xi32>
    %12 = arith.cmpi slt, %10, %11 : vector<2x128xi32>
    %cst_8 = arith.constant 0xFF800000 : f32
    %13 = vector.broadcast %cst_8 : f32 to vector<2x128xf32>
    %14 = arith.select %12, %9, %13 : vector<2x128xi1>, vector<2x128xf32>
    %cst_9 = arith.constant dense<0xFF800000> : vector<2xf32>
    %15 = vector.multi_reduction <maximumf>, %14, %cst_9 [1] : vector<2x128xf32> to vector<2xf32>
    %16 = vector.shape_cast %15 : vector<2xf32> to vector<2x1xf32>
    %17 = vector.broadcast %16 : vector<2x1xf32> to vector<2x128xf32>
    %18 = arith.cmpf oge, %14, %17 : vector<2x128xf32>
    %c128_i32 = arith.constant 128 : i32
    %19 = vector.broadcast %c128_i32 : i32 to vector<2x128xi32>
    %20 = arith.select %18, %10, %19 : vector<2x128xi1>, vector<2x128xi32>
    %cst_10 = arith.constant dense<2147483647> : vector<2xi32>
    %21 = vector.multi_reduction <minsi>, %20, %cst_10 [1] : vector<2x128xi32> to vector<2xi32>
    %22 = vector.shape_cast %21 : vector<2xi32> to vector<2x1xi32>
    %23 = vector.broadcast %22 : vector<2x1xi32> to vector<2x128xi32>
    %24 = arith.cmpi eq, %10, %23 : vector<2x128xi32>
    %25 = arith.extui %24 : vector<2x128xi1> to vector<2x128xi32>
    %26 = arith.sitofp %25 : vector<2x128xi32> to vector<2x128xf32>
    %c0_11 = arith.constant 0 : index
    %c0_12 = arith.constant 0 : index
    %27 = vector.load %arg13[%c0_11, %c0_12] : memref<2x128xf32, #tpu.memory_space<vmem>>, vector<2x128xf32>
    tpu.vector_store %arg13[%c0_11, %c0_12], %26 {strides = array<i32>} : memref<2x128xf32, #tpu.memory_space<vmem>>, vector<2x128xf32>,
    %c0_13 = arith.constant 0 : index
    %c0_14 = arith.constant 0 : index
    %28 = vector.load %arg1[%c0_13, %c0_14] : memref<2x100xbf16, #tpu.memory_space<vmem>>, vector<2x100xbf16>
    %c0_15 = arith.constant 0 : index
    %c0_16 = arith.constant 0 : index
    %29 = vector.load %arg4[%c0_15, %c0_16] : memref<100x96xbf16, #tpu.memory_space<vmem>>, vector<100x96xbf16>
    %cst_17 = arith.constant dense<0.000000e+00> : vector<2x96xf32>
    %30 = tpu.matmul %28, %29, %cst_17 {dimension_numbers = #tpu.dot_dimension_numbers<[1], [0], [0], [1], [0, 0, 1, 1], [], []>} : vector<2x100xbf16>, vector<100x96xbf16>, vector<2x96xf32> -> vector<2x96xf32>
    %c0_18 = arith.constant 0 : index
    %c0_19 = arith.constant 0 : index
    %31 = vector.load %arg5[%c0_18, %c0_19] : memref<1x96xf32, #tpu.memory_space<vmem>>, vector<1x96xf32>
    %32 = vector.broadcast %31 : vector<1x96xf32> to vector<2x96xf32>
    %33 = arith.addf %30, %32 : vector<2x96xf32>
    %34 = math.tanh %33 : vector<2x96xf32>
    %c0_20 = arith.constant 0 : index
    %c0_21 = arith.constant 0 : index
    %35 = vector.load %arg14[%c0_20, %c0_21] : memref<2x96xf32, #tpu.memory_space<vmem>>, vector<2x96xf32>
    tpu.vector_store %arg14[%c0_20, %c0_21], %34 {strides = array<i32>} : memref<2x96xf32, #tpu.memory_space<vmem>>, vector<2x96xf32>,
    %36 = vector.extract_strided_slice %34 {offsets = [0, 0], sizes = [2, 32], strides = [1, 1]} : vector<2x96xf32> to vector<2x32xf32>
    %c1_i32 = arith.constant 1 : i32
    %37 = vector.broadcast %c1_i32 : i32 to vector<2x1xi32>
    %38 = arith.cmpi eq, %22, %37 : vector<2x1xi32>
    %39 = vector.extract_strided_slice %34 {offsets = [0, 32], sizes = [2, 32], strides = [1, 1]} : vector<2x96xf32> to vector<2x32xf32>
    %40 = vector.shape_cast %38 : vector<2x1xi1> to vector<2x1xi1>
    %41 = vector.broadcast %40 : vector<2x1xi1> to vector<2x32xi1>
    %42 = arith.select %41, %39, %36 : vector<2x32xi1>, vector<2x32xf32>
    %c2_i32 = arith.constant 2 : i32
    %43 = vector.broadcast %c2_i32 : i32 to vector<2x1xi32>
    %44 = arith.cmpi eq, %22, %43 : vector<2x1xi32>
    %45 = vector.extract_strided_slice %34 {offsets = [0, 64], sizes = [2, 32], strides = [1, 1]} : vector<2x96xf32> to vector<2x32xf32>
    %46 = vector.shape_cast %44 : vector<2x1xi1> to vector<2x1xi1>
    %47 = vector.broadcast %46 : vector<2x1xi1> to vector<2x32xi1>
    %48 = arith.select %47, %45, %42 : vector<2x32xi1>, vector<2x32xf32>
    %49 = arith.truncf %48 : vector<2x32xf32> to vector<2x32xbf16>
    %c0_22 = arith.constant 0 : index
    %c0_23 = arith.constant 0 : index
    %50 = vector.load %arg8[%c0_22, %c0_23] : memref<32x32xbf16, #tpu.memory_space<vmem>>, vector<32x32xbf16>
    %cst_24 = arith.constant dense<0.000000e+00> : vector<2x32xf32>
    %51 = tpu.matmul %49, %50, %cst_24 {dimension_numbers = #tpu.dot_dimension_numbers<[1], [0], [0], [1], [0, 0, 1, 1], [], []>} : vector<2x32xbf16>, vector<32x32xbf16>, vector<2x32xf32> -> vector<2x32xf32>
    %c0_25 = arith.constant 0 : index
    %c0_26 = arith.constant 0 : index
    %52 = vector.load %arg9[%c0_25, %c0_26] : memref<1x32xf32, #tpu.memory_space<vmem>>, vector<1x32xf32>
    %53 = vector.broadcast %52 : vector<1x32xf32> to vector<2x32xf32>
    %54 = arith.addf %51, %53 : vector<2x32xf32>
    %55 = arith.addf %0, %54 : vector<2x32xf32>
    %cst_27 = arith.constant dense<0.000000e+00> : vector<2xf32>
    %56 = vector.multi_reduction <add>, %55, %cst_27 [1] : vector<2x32xf32> to vector<2xf32>
    %57 = vector.shape_cast %56 : vector<2xf32> to vector<2x1xf32>
    %cst_28 = arith.constant 3.200000e+01 : f32
    %58 = vector.broadcast %cst_28 : f32 to vector<2x1xf32>
    %59 = arith.divf %57, %58 : vector<2x1xf32>
    %60 = arith.mulf %55, %55 : vector<2x32xf32>
    %cst_29 = arith.constant dense<0.000000e+00> : vector<2xf32>
    %61 = vector.multi_reduction <add>, %60, %cst_29 [1] : vector<2x32xf32> to vector<2xf32>
    %62 = vector.shape_cast %61 : vector<2xf32> to vector<2x1xf32>
    %cst_30 = arith.constant 3.200000e+01 : f32
    %63 = vector.broadcast %cst_30 : f32 to vector<2x1xf32>
    %64 = arith.divf %62, %63 : vector<2x1xf32>
    %65 = arith.mulf %59, %59 : vector<2x1xf32>
    %66 = arith.subf %64, %65 : vector<2x1xf32>
    %cst_31 = arith.constant 0.000000e+00 : f32
    %67 = vector.broadcast %cst_31 : f32 to vector<2x1xf32>
    %68 = arith.maximumf %66, %67 : vector<2x1xf32>
    %69 = vector.broadcast %59 : vector<2x1xf32> to vector<2x32xf32>
    %70 = arith.subf %55, %69 : vector<2x32xf32>
    %cst_32 = arith.constant 9.99999974E-6 : f32
    %71 = vector.broadcast %cst_32 : f32 to vector<2x1xf32>
    %72 = arith.addf %68, %71 : vector<2x1xf32>
    %73 = math.rsqrt %72 : vector<2x1xf32>
    %74 = vector.broadcast %73 : vector<2x1xf32> to vector<2x32xf32>
    %75 = arith.mulf %70, %74 : vector<2x32xf32>
    %c0_33 = arith.constant 0 : index
    %c0_34 = arith.constant 0 : index
    %76 = vector.load %arg10[%c0_33, %c0_34] : memref<1x32xf32, #tpu.memory_space<vmem>>, vector<1x32xf32>
    %77 = vector.broadcast %76 : vector<1x32xf32> to vector<2x32xf32>
    %78 = arith.mulf %75, %77 : vector<2x32xf32>
    %c0_35 = arith.constant 0 : index
    %c0_36 = arith.constant 0 : index
    %79 = vector.load %arg11[%c0_35, %c0_36] : memref<1x32xf32, #tpu.memory_space<vmem>>, vector<1x32xf32>
    %80 = vector.broadcast %79 : vector<1x32xf32> to vector<2x32xf32>
    %81 = arith.addf %78, %80 : vector<2x32xf32>
    %82 = arith.negf %81 : vector<2x32xf32>
    %83 = math.exp %82 : vector<2x32xf32>
    %cst_37 = arith.constant 1.000000e+00 : f32
    %84 = vector.broadcast %cst_37 : f32 to vector<2x32xf32>
    %85 = arith.addf %84, %83 : vector<2x32xf32>
    %86 = arith.divf %84, %85 : vector<2x32xf32>
    %c0_38 = arith.constant 0 : index
    %c0_39 = arith.constant 0 : index
    %87 = vector.load %arg12[%c0_38, %c0_39] : memref<2x32xf32, #tpu.memory_space<vmem>>, vector<2x32xf32>
    tpu.vector_store %arg12[%c0_38, %c0_39], %86 {strides = array<i32>} : memref<2x32xf32, #tpu.memory_space<vmem>>, vector<2x32xf32>,
    return
  }
  func.func @transform_0(%arg0: i32) -> (i32, i32) {
    %c0_i32 = arith.constant 0 : i32
    %c0_i32_0 = arith.constant 0 : i32
    return %arg0, %c0_i32 : i32, i32
  }
  func.func @transform_1(%arg0: i32) -> (i32, i32) {
    %c0_i32 = arith.constant 0 : i32
    %c0_i32_0 = arith.constant 0 : i32
    return %arg0, %c0_i32 : i32, i32
  }
  func.func @transform_2(%arg0: i32) -> (i32, i32) {
    %c0_i32 = arith.constant 0 : i32
    %c0_i32_0 = arith.constant 0 : i32
    return %arg0, %c0_i32 : i32, i32
  }
  func.func @transform_3(%arg0: i32) -> (i32, i32) {
    %c0_i32 = arith.constant 0 : i32
    %c0_i32_0 = arith.constant 0 : i32
    %c0_i32_1 = arith.constant 0 : i32
    return %c0_i32, %c0_i32_0 : i32, i32
  }
  func.func @transform_4(%arg0: i32) -> (i32, i32) {
    %c0_i32 = arith.constant 0 : i32
    %c0_i32_0 = arith.constant 0 : i32
    %c0_i32_1 = arith.constant 0 : i32
    return %c0_i32, %c0_i32_0 : i32, i32
  }
  func.func @transform_5(%arg0: i32) -> (i32, i32) {
    %c0_i32 = arith.constant 0 : i32
    %c0_i32_0 = arith.constant 0 : i32
    %c0_i32_1 = arith.constant 0 : i32
    return %c0_i32, %c0_i32_0 : i32, i32
  }
  func.func @transform_6(%arg0: i32) -> (i32, i32) {
    %c0_i32 = arith.constant 0 : i32
    %c0_i32_0 = arith.constant 0 : i32
    %c0_i32_1 = arith.constant 0 : i32
    return %c0_i32, %c0_i32_0 : i32, i32
  }
  func.func @transform_7(%arg0: i32) -> (i32, i32) {
    %c0_i32 = arith.constant 0 : i32
    %c0_i32_0 = arith.constant 0 : i32
    %c0_i32_1 = arith.constant 0 : i32
    return %c0_i32, %c0_i32_0 : i32, i32
  }
  func.func @transform_8(%arg0: i32) -> (i32, i32) {
    %c0_i32 = arith.constant 0 : i32
    %c0_i32_0 = arith.constant 0 : i32
    %c0_i32_1 = arith.constant 0 : i32
    return %c0_i32, %c0_i32_0 : i32, i32
  }
  func.func @transform_9(%arg0: i32) -> (i32, i32) {
    %c0_i32 = arith.constant 0 : i32
    %c0_i32_0 = arith.constant 0 : i32
    %c0_i32_1 = arith.constant 0 : i32
    return %c0_i32, %c0_i32_0 : i32, i32
  }
  func.func @transform_10(%arg0: i32) -> (i32, i32) {
    %c0_i32 = arith.constant 0 : i32
    %c0_i32_0 = arith.constant 0 : i32
    %c0_i32_1 = arith.constant 0 : i32
    return %c0_i32, %c0_i32_0 : i32, i32
  }
  func.func @transform_11(%arg0: i32) -> (i32, i32) {
    %c0_i32 = arith.constant 0 : i32
    %c0_i32_0 = arith.constant 0 : i32
    return %arg0, %c0_i32 : i32, i32
  }
  func.func @transform_12(%arg0: i32) -> (i32, i32) {
    %c0_i32 = arith.constant 0 : i32
    %c0_i32_0 = arith.constant 0 : i32
    return %arg0, %c0_i32 : i32, i32
  }
  func.func @transform_13(%arg0: i32) -> (i32, i32) {
    %c0_i32 = arith.constant 0 : i32
    %c0_i32_0 = arith.constant 0 : i32
    return %arg0, %c0_i32 : i32, i32
  }
}

</mosaic_0001>

<bundles_post_ra>
// kernel: tpu_custom_call.1
= control target key start
LH: loop header
LB: loop body
LE: loop exit
PB: predicated region body
PF: predicated region fallthrough
CT: control target
= control target key end

     0   :  { %19 = vsyncpa [#allocation3], 0  ;;  %s818_s0 = inlined_call_operand.vmem [shape: bf16[2,100], index: 0, kind: input, shape index: {}]   ;;  %s819_s1 = inlined_call_operand.hbm [shape: f32[2,32], index: 1, kind: input, shape index: {}, may-alias: {1,11}]   ;;  %s820_s2 = inlined_call_operand.vmem [shape: f32[2,128], index: 2, kind: input, shape index: {}]   ;;  %s821_s3 = inlined_call_operand.vmem [shape: bf16[100,96], index: 3, kind: input, shape index: {}]   ;;  %s822_s4 = inlined_call_operand.vmem [shape: f32[1,96], index: 4, kind: input, shape index: {}]   ;;  %s823_s5 = inlined_call_operand.vmem [shape: f32[32,128], index: 5, kind: input, shape index: {}]   ;;  %s824_s6 = inlined_call_operand.vmem [shape: f32[1,128], index: 6, kind: input, shape index: {}]   ;;  %s825_s7 = inlined_call_operand.vmem [shape: bf16[32,32], index: 7, kind: input, shape index: {}]   ;;  %s826_s8 = inlined_call_operand.vmem [shape: f32[1,32], index: 8, kind: input, shape index: {}]   ;;  %s827_s9 = inlined_call_operand.vmem [shape: f32[1,32], index: 9, kind: input, shape index: {}]   ;;  %s828_s10 = inlined_call_operand.vmem [shape: f32[1,32], index: 10, kind: input, shape index: {}]   ;;  %s829_s11 = inlined_call_operand.hbm [shape: f32[2,32], index: 11, kind: output, shape index: {0}, may-alias: {1,11}]   ;;  %s830_s12 = inlined_call_operand.hbm [shape: f32[2,128], index: 12, kind: output, shape index: {1}]   ;;  %s831_s13 = inlined_call_operand.hbm [shape: f32[2,96], index: 13, kind: output, shape index: {2}]  }
   0x1   :  { %20 = vsyncpa [#allocation4], 0 }
   0x2   :  { %21 = vsyncpa [#allocation7], 0  ;;  %s636_s25 = smov [#allocation2]  }
   0x3   :  { %s30_s26 = sshll.u32 %s636_s25, 4  ;;  %s31_s26 = int_to_ptr.vmem [resolvable:$true] %s30_s26 }
   0x4   :  { %s558_s27 = scalar_lea.vmem %s31_s26, 32  ;;  %p563_p1 = scmp.lt.s32.totalorder %s31_s26, %s31_s26 }
   0x5   :  { %p559_p0 = scmp.ne.s32.totalorder %s31_s26, %s558_s27  ;;  %p564_p2 = scmp.lt.s32.totalorder %s558_s27, %s558_s27 }
   0x7   :  { %p565_p3 = por %p564_p2, %p563_p1 }
   0x9   :  { %p566_p4 = pnand %p565_p3, %p559_p0 }
   0xb   :  { %569 = shalt.err (!%p566_p4)
}
   0xc   :  { %33 = dma.hbm_to_vmem [thread:$0]  %s819_s1, 32, %s31_s26, [#allocation3]  }
   0xd   :  { %630 = dma.done.wait [#allocation3], 32  }
   0xe   :  { %631 = vsyncadd [#allocation3], 4294967264  ;;  %v637_v0 = vmov 0.0   ;;  %vm638_vm0 = vmmov 0   ;;  %v60_v1 = vld [vmem:[%s823_s5 + $0x18] sm:$0xff]  ;;  %v59_v2 = vld [vmem:[%s823_s5 + $0x10] sm:$0xff]  ;;  %v144_v15 = vlaneseq }
   0xf   :  { %488 = vmatprep.subr.mxu0 %v637_v0  ;;  %496 = vmatprep.mubr.msk.f32.mxu0 %vm638_vm0, %v637_v0  ;;  %v58_v3 = vld [vmem:[%s823_s5 + $0x8] sm:$0xff]  ;;  %vm68_vm1 = vcmask 261120   ;;  %v57_v4 = vld [vmem:[%s823_s5] sm:$0xff]  ;;  %v533_v6 = vld [vmem:[%s821_s3 + $0x30] ss:$0 sps:$4 sm:$0x33]  }
  0x10   :  { %499 = vmatprep.subr.bf16.mxu1 %v637_v0  ;;  %513 = vmatprep.mubr.msk.bf16.mxu1 %vm638_vm0, %v637_v0  ;;  %v736_v5 = vld [vmem:[#allocation2] sm:$0x3]  ;;  %vm148_vm2 = vcmask 1041408   ;;  %v534_v8 = vld [vmem:[%s821_s3 + $0x28] sm:$0xff]   ;;  %v536_v10 = vld [vmem:[%s821_s3 + $0x18] sm:$0xff]   ;;  %vm233_vm3 = vcmask 818176  }
  0x11   :  { %489 = vmatpush3.msra.mxu0 %v60_v1  ;;  %v238_v7 = vsel %vm148_vm2, %v533_v6, 0  ;;  %v535_v9 = vld [vmem:[%s821_s3 + $0x20] sm:$0xff]   ;;  %v537_v11 = vld [vmem:[%s821_s3 + $0x10] sm:$0xff]   ;;  %v538_v12 = vld [vmem:[%s821_s3 + $0x8] sm:$0xff]   ;;  %v145_v17 = vand.u32 127, %v144_v15  ;;  %vm281_vm6 = vcmask 779264  }
  0x12   :  { %490 = vmatprep.subr.mxu0 %v637_v0  ;;  %500 = vmatpush3.bf16.msra.mxu1 %v238_v7  ;;  %v539_v13 = vld [vmem:[%s821_s3] sm:$0xff]   ;;  %s639_s3 = smov 32   ;;  %v540_v42 = vld [vmem:[%s825_s7 + $0x8] sm:$0xff]   ;;  %vm370_vm11 = vcmask 254976   ;;  %s641_s24 = smov [#allocation6]  }
  0x13   :  { %491 = vmatpush3.msra.mxu0 %v59_v2  ;;  %501 = vmatprep.subr.bf16.mxu1 %v637_v0  ;;  %v173_v14 = vld [vmem:[%s818_s0] sm:$0x1]  ;;  %vm146_vm4 = vcmp.lt.s32.totalorder %v145_v17, 3  ;;  %s427_s25 = sshll.u32 %s641_s24, 4  ;;  %s428_s25 = int_to_ptr.vmem [resolvable:$true] %s427_s25 }
  0x14   :  { %492 = vmatprep.subr.mxu0 %v637_v0  ;;  %v453_v16 = vld [vmem:[%s824_s6] ss:$0 sm:$0xff]  ;;  %s570_s26 = scalar_lea.vmem %s428_s25, 32  ;;  %p575_p6 = scmp.lt.s32.totalorder %s428_s25, %s428_s25 }
  0x15   :  { %493 = vmatpush3.msra.mxu0 %v58_v3  ;;  %v142_v19 = vld [vmem:[%s820_s2] sm:$0x3]  ;;  %p571_p5 = scmp.ne.s32.totalorder %s428_s25, %s570_s26  ;;  %p576_p7 = scmp.lt.s32.totalorder %s570_s26, %s570_s26 }
  0x16   :  { %494 = vmatprep.subr.mxu0 %v637_v0  ;;  %502 = vmatpush3.bf16.msra.mxu1 %v534_v8  ;;  %v456_v33 = vld [vmem:[%s822_s4] ss:$0 sm:$0xff] }
  0x17   :  { %495 = vmatpush3.msra.mxu0 %v57_v4  ;;  %503 = vmatprep.subr.bf16.mxu1 %v637_v0  ;;  %v541_v43 = vld [vmem:[%s825_s7] sm:$0xff]   ;;  %s640_s7 = smov 64   ;;  %p577_p8 = por %p576_p7, %p575_p6 }
  0x18   :  { %497 = vmatmul.mubr.msk.f32.vlgmr.msra.gmra.mxu0 %vm68_vm1, %v736_v5  ;;  %517 = vmatprep.subr.bf16.mxu0 %v637_v0  ;;  %v465_v55 = vld [vmem:[%s826_s8] ss:$0 sm:$0xff] }
  0x19   :  { %521 = vmatprep.mubr.msk.bf16.mxu0 %vm638_vm0, %v637_v0  ;;  %518 = vmatpush3.bf16.msra.mxu0 %v540_v42  ;;  %p578_p9 = pnand %p577_p8, %p571_p5 }
  0x1a   :  { %504 = vmatpush3.bf16.msra.mxu1 %v535_v9  ;;  %519 = vmatprep.subr.bf16.mxu0 %v637_v0 }
  0x1b   :  { %505 = vmatprep.subr.bf16.mxu1 %v637_v0 }
  0x1d   :  { %520 = vmatpush3.bf16.msra.mxu0 %v541_v43 }
  0x1e   :  { %506 = vmatpush3.bf16.msra.mxu1 %v536_v10 }
  0x1f   :  { %507 = vmatprep.subr.bf16.mxu1 %v637_v0 }
  0x22   :  { %508 = vmatpush3.bf16.msra.mxu1 %v537_v11 }
  0x23   :  { %509 = vmatprep.subr.bf16.mxu1 %v637_v0 }
  0x26   :  { %510 = vmatpush3.bf16.msra.mxu1 %v538_v12 }
  0x27   :  { %511 = vmatprep.subr.bf16.mxu1 %v637_v0 }
  0x2a   :  { %512 = vmatpush3.bf16.msra.mxu1 %v539_v13 }
  0x2d   :  { %514 = vmatmul.mubr.msk.bf16.vlgmr.msra.gmra.mxu1 %vm233_vm3, %v173_v14 }
  0xd8   :  { %v138_v18 = vpop.f32.mrf.mxu0 }
  0xd9   :  { %v139_v20 = vadd.f32 %v453_v16, %v138_v18 }
  0xda   :  { %v498_v21 = vpop.f32.mrf.mxu0 }
  0xdb   :  { %v143_v22 = vadd.f32 %v142_v19, %v139_v20 }
  0xdd   :  { %v147_v23 = vsel %vm146_vm4, %v143_v22, -inf }
  0xde   :  { %v149_v24 = vsel %vm148_vm2, %v147_v23, -inf }
  0xdf   :  { %150 = vmax.xlane.f32.xlu0 %v149_v24 }
  0xed   :  { %v274_v30 = vpop.f32.mrf.mxu1 }
  0xee   :  { %v275_v35 = vadd.f32 %v456_v33, %v274_v30 }
  0xef   :  { %v515_v31 = vpop.f32.mrf.mxu1 }
  0xf0   :  { %542 = vtanh.f32 %v275_v35 }
  0xf1   :  { %v277_v32 = vpop.f32.mrf.mxu1 }
  0xf3   :  { %v516_v34 = vpop.f32.mrf.mxu1 }
  0xfd   :  { %v543_v36 = vpop.eup %542 }
  0xfe   :  { %282 = vst.msk [vmem:[#allocation8] sm:$0x3] %vm281_vm6, %v543_v36 }
 0x168   :  { %v151_v25 = vpop.xlane.xlu0 %150 }
 0x169   :  { %vm152_vm5 = vcmp.ge.f32.partialorder %v147_v23, %v151_v25 }
 0x16a   :  { %v153_v26 = vsel %vm152_vm5, %v145_v17, 128 }
 0x16b   :  { %v154_v27 = vsel %vm148_vm2, %v153_v26, 2147483647 }
 0x16c   :  { %v156_v28 = vshra.s32 %v154_v27, 16  ;;  %v155_v37 = vand.u32 65535, %v154_v27 }
 0x16e   :  { %v158_v29 = vcvt.s32.f32 %v156_v28  ;;  %v157_v39 = vcvt.s32.f32 %v155_v37 }
 0x170   :  { %159 = vmin.xlane.f32.xlu0 %v158_v29 }
 0x1f9   :  { %v160_v38 = vpop.xlane.xlu0 %159 }
 0x1fa   :  { %vm161_vm7 = vcmp.eq.f32.partialorder %v158_v29, %v160_v38  ;;  %v166_v41 = vcvt.f32.s32 %v160_v38 }
 0x1fb   :  { %v162_v40 = vsel %vm161_vm7, %v157_v39, inf }
 0x1fc   :  { %163 = vmin.xlane.f32.xlu1 %v162_v40  ;;  %v167_v45 = vshll.u32 %v166_v41, 16 }
 0x20d   :  { %287 = vrot.lane.b32.xlu1 %v543_v36, %s639_s3 }
 0x285   :  { %v164_v44 = vpop.xlane.xlu1 %163 }
 0x286   :  { %v165_v46 = vcvt.f32.s32 %v164_v44 }
 0x288   :  { %v168_v47 = vadd.s32 %v167_v45, %v165_v46 }
 0x289   :  { %v288_v48 = vpop.permute.xlu1 %287 }
 0x28a   :  { %vm283_vm8 = vcmp.eq.s32.totalorder %v168_v47, 1  ;;  %vm169_vm9 = vcmp.eq.s32.totalorder %v145_v17, %v168_v47  ;;  %vm291_vm10 = vcmp.eq.s32.totalorder %v168_v47, 2 }
 0x28b   :  { %v290_v49 = vsel %vm283_vm8, %v543_v36, %v288_v48  ;;  %v455_v50 = vsel %vm169_vm9, 1.0, %v637_v0 }
 0x28c   :  { %295 = vrot.lane.b32.xlu0 %v290_v49, %s639_s3  ;;  %172 = vst [vmem:[#allocation6] sm:$0x3] %v455_v50 }
 0x2fe   :  { %v296_v51 = vpop.permute.xlu0 %295 }
 0x2ff   :  { %v298_v52 = vsel %vm291_vm10, %v543_v36, %v296_v51 }
 0x300   :  { %v299_v53 = vpack.c.bf16 %v298_v52, %v298_v52 }
 0x302   :  { %312 = vrot.lane.b32.xlu1 %v299_v53, %s640_s7 }
 0x374   :  { %v313_v54 = vpop.permute.xlu1 %312 }
 0x375   :  { %522 = vmatmul.mubr.msk.bf16.vlgmr.msra.gmra.mxu0 %vm68_vm1, %v313_v54 }
 0x435   :  { %v363_v56 = vpop.f32.mrf.mxu0 }
 0x436   :  { %v364_v57 = vadd.f32 %v465_v55, %v363_v56 }
 0x437   :  { %v523_v58 = vpop.f32.mrf.mxu0 }
 0x438   :  { %v369_v59 = vadd.f32 %v364_v57, %v736_v5 }
 0x439   :  { %v366_v60 = vpop.f32.mrf.mxu0 }
 0x43a   :  { %v371_v61 = vsel %vm370_vm11, %v369_v59, 0.0  ;;  %v376_v62 = vmul.f32 %v369_v59, %v369_v59 }
 0x43b   :  { %372 = vadd.xlane.f32.xlu1 %v371_v61  ;;  %v524_v63 = vpop.f32.mrf.mxu0 }
 0x43c   :  { %v377_v0 = vsel %vm370_vm11, %v376_v62, 0.0 }
 0x43d   :  { %378 = vadd.xlane.f32.xlu0 %v377_v0 }
 0x43e   :  { %581 = shalt.err (!%p578_p9)
}
 0x43f   :  { %430 = dma.vmem_to_hbm [thread:$0]  %s428_s25, 32, %s830_s12, [#allocation7]  }
 0x440   :  { %s642_s28 = smov [#allocation8]  }
 0x441   :  { %s437_s29 = sshll.u32 %s642_s28, 4  ;;  %s438_s29 = int_to_ptr.vmem [resolvable:$true] %s437_s29 }
 0x442   :  { %s590_s30 = scalar_lea.vmem %s438_s29, 32  ;;  %p595_p11 = scmp.lt.s32.totalorder %s438_s29, %s438_s29 }
 0x443   :  { %p591_p10 = scmp.ne.s32.totalorder %s438_s29, %s590_s30  ;;  %p596_p12 = scmp.lt.s32.totalorder %s590_s30, %s590_s30 }
 0x445   :  { %p597_p13 = por %p596_p12, %p595_p11 }
 0x447   :  { %p598_p0 = pnand %p597_p13, %p591_p10 }
 0x449   :  { %601 = shalt.err (!%p598_p0)
}
 0x44a   :  { %440 = dma.vmem_to_hbm [thread:$0]  %s438_s29, 32, %s831_s13, [#allocation7]   ;;  %v469_v11 = vld [vmem:[%s827_s9] ss:$0 sm:$0xff] }
 0x44b   :  { %v470_v13 = vld [vmem:[%s828_s10] ss:$0 sm:$0xff]  ;;  %s643_s13 = smov [#allocation5]  }
 0x44c   :  { %s417_s18 = sshll.u32 %s643_s13, 4  ;;  %s418_s18 = int_to_ptr.vmem [resolvable:$true] %s417_s18 }
 0x44d   :  { %s610_s19 = scalar_lea.vmem %s418_s18, 32  ;;  %p615_p2 = scmp.lt.s32.totalorder %s418_s18, %s418_s18 }
 0x44e   :  { %p611_p1 = scmp.ne.s32.totalorder %s418_s18, %s610_s19  ;;  %p616_p3 = scmp.lt.s32.totalorder %s610_s19, %s610_s19 }
 0x450   :  { %p617_p4 = por %p616_p3, %p615_p2 }
 0x452   :  { %p618_p5 = pnand %p617_p4, %p611_p1 }
 0x4c4   :  { %v373_v1 = vpop.xlane.xlu1 %372 }
 0x4c5   :  { %v375_v2 = vmul.f32 0.03125, %v373_v1 }
 0x4c6   :  { %v379_v3 = vpop.xlane.xlu0 %378 }
 0x4c7   :  { %v381_v4 = vmul.f32 %v375_v2, %v375_v2  ;;  %v380_v5 = vmul.f32 0.03125, %v379_v3  ;;  %v384_v9 = vsub.f32 %v369_v59, %v375_v2 }
 0x4c9   :  { %v382_v6 = vsub.f32 %v380_v5, %v381_v4 }
 0x4cb   :  { %v383_v7 = vmax.f32 %v382_v6, 0.0 }
 0x4cd   :  { %v385_v8 = vadd.f32 1e-05, %v383_v7 }
 0x4cf   :  { %544 = vrsqrt.f32 %v385_v8 }
 0x4dc   :  { %v545_v10 = vpop.eup %544 }
 0x4dd   :  { %v387_v12 = vmul.f32 %v545_v10, %v384_v9 }
 0x4df   :  { %v395_v14 = vmul.f32 %v469_v11, %v387_v12 }
 0x4e1   :  { %v403_v15 = vadd.f32 %v470_v13, %v395_v14 }
 0x4e3   :  { %v471_v16 = vmul.f32 -1.442695, %v403_v15 }
 0x4e5   :  { %546 = vpow2.f32 %v471_v16 }
 0x4f2   :  { %v547_v17 = vpop.eup %546 }
 0x4f3   :  { %v407_v18 = vadd.f32 1.0, %v547_v17 }
 0x4f5   :  { %548 = vrcp.f32 %v407_v18 }
 0x502   :  { %v549_v19 = vpop.eup %548 }
 0x503   :  { %410 = vst.msk [vmem:[#allocation5] sm:$0x3] %vm370_vm11, %v549_v19 }
 0x504   :  { %621 = shalt.err (!%p618_p5)
}
 0x505   :  { %420 = dma.vmem_to_hbm [thread:$0]  %s418_s18, 32, %s829_s11, [#allocation4]  }
 0x506   :  { %632 = dma.done.wait [#allocation4], 32  }
 0x507   :  { %633 = vsyncadd [#allocation4], 4294967264 }
 0x508   :  { %634 = dma.done.wait [#allocation7], 64  }
 0x509   :  { %635 = vsyncadd [#allocation7], 4294967232 }
 0x50a   :  { %450 = vsyncpa [#allocation3], 1 }
 0x50b   :  { %451 = vsyncpa [#allocation4], 1 }
 0x50c   :  { %452 = vsyncpa [#allocation7], 1 }

</bundles_post_ra>
